<compile_context>
chip_gen: v7x
topology: tpu7x:2x2x1
jax: 0.10.0
libtpu: 0.0.40
codegen_flags: <defaults>
</compile_context>

<pallas_src>
import functools
import math

import jax
import jax.numpy as jnp
from jax.experimental import pallas as pl
from jax.experimental.pallas import tpu as pltpu

# num_ftrs comes from `model.fc.in_features` in the original script; pick a small
# deterministic value so input dim = 3 * num_ftrs stays small.
NUM_FTRS = 64
IN_DIM = 3 * NUM_FTRS          # 192
H1, H2, OUT = 177, 76, 1
# Lane-dense padded widths (multiples of 128).
H1P, H2P, OUTP = 256, 128, 128
BN_EPS = 1e-5


def _pad_to(a, *target):
    """Zero-pad each dim of `a` up to the given target sizes."""
    return jnp.pad(a, tuple((0, t - s) for s, t in zip(a.shape, target)))


# ------------- pass 1: layer_1 + ReLU, batch-statistics accumulation ---------------
def _layer1_stats_kernel(x_ref, w1_ref, b1_ref, h1_ref, stats_ref, *, batch, tile_b):
    i = pl.program_id(0)

    @pl.when(i == 0)
    def _init():
        stats_ref[...] = jnp.zeros_like(stats_ref)

    # bf16 MXU inputs, f32 accumulation; bias/ReLU in f32.
    x = x_ref[...].astype(jnp.bfloat16)
    h1 = jnp.dot(x, w1_ref[...], preferred_element_type=jnp.float32) + b1_ref[...]
    h1 = jnp.maximum(h1, 0.0)

    # Mask rows past the true batch so BatchNorm statistics match the un-padded batch.
    row = i * tile_b + jax.lax.broadcasted_iota(jnp.int32, (tile_b, 1), 0)
    h1m = jnp.where(row < batch, h1, 0.0)
    stats_ref[...] += jnp.concatenate(
        [jnp.sum(h1m, axis=0, keepdims=True),          # row 0: sum
         jnp.sum(h1m * h1m, axis=0, keepdims=True)],   # row 1: sum of squares
        axis=0)

    h1_ref[...] = h1.astype(jnp.bfloat16)


# ------------- pass 2: (BatchNorm folded into W2/b2) + ReLU + layer_out -------------
def _layer23_kernel(h1_ref, w2_ref, b2_ref, w3_ref, b3_ref, out_ref):
    h2 = jnp.dot(h1_ref[...], w2_ref[...], preferred_element_type=jnp.float32) + b2_ref[...]
    h2 = jnp.maximum(h2, 0.0)
    out_ref[...] = jnp.dot(h2.astype(jnp.bfloat16), w3_ref[...],
                           preferred_element_type=jnp.float32) + b3_ref[...]


def binary_classification_forward(x, params, *, tile_b=512):
    """x: (B, IN_DIM) float32. Training-mode BatchNorm (full-batch statistics)."""
    B = x.shape[0]
    n_tiles = pl.cdiv(B, tile_b)
    b_pad = n_tiles * tile_b
    x_pad = _pad_to(x, b_pad, IN_DIM)

    # Padded / bf16 layer-1 parameters (resident in VMEM across the grid).
    w1 = _pad_to(params["w1"], IN_DIM, H1P).astype(jnp.bfloat16)
    b1 = _pad_to(params["b1"], H1P).reshape(1, H1P)

    # ---- pass 1 ----
    k1 = functools.partial(_layer1_stats_kernel, batch=B, tile_b=tile_b)
    flops1 = 2 * b_pad * IN_DIM * H1P
    bytes1 = (b_pad * IN_DIM * 4 + IN_DIM * H1P * 2 + H1P * 4
              + b_pad * H1P * 2 + 2 * H1P * 4)
    h1, stats = pl.pallas_call(
        k1,
        out_shape=(jax.ShapeDtypeStruct((b_pad, H1P), jnp.bfloat16),
                   jax.ShapeDtypeStruct((2, H1P), jnp.float32)),
        grid_spec=pltpu.PrefetchScalarGridSpec(
            num_scalar_prefetch=0,
            grid=(n_tiles,),
            in_specs=[
                pl.BlockSpec((tile_b, IN_DIM), lambda i: (i, 0)),   # x streams per tile
                pl.BlockSpec((IN_DIM, H1P), lambda i: (0, 0)),      # W1 resident
                pl.BlockSpec((1, H1P), lambda i: (0, 0)),           # b1 resident
            ],
            out_specs=[
                pl.BlockSpec((tile_b, H1P), lambda i: (i, 0)),      # h1 streams per tile
                pl.BlockSpec((2, H1P), lambda i: (0, 0)),           # stats accumulator
            ]),
        # Accumulator output resident across the batch axis -> must be "arbitrary".
        compiler_params=pltpu.CompilerParams(dimension_semantics=("arbitrary",)),
        cost_estimate=pl.CostEstimate(flops=flops1, transcendentals=0,
                                      bytes_accessed=bytes1),
    )(x_pad, w1, b1)

    # ---- BatchNorm (training-mode, biased variance) folded into layer_2 ----
    mean = stats[0] / B
    var = jnp.maximum(stats[1] / B - mean * mean, 0.0)
    gamma = _pad_to(params["gamma"], H1P)
    beta = _pad_to(params["beta"], H1P)
    scale = gamma * jax.lax.rsqrt(var + BN_EPS)        # f32
    shift = beta - mean * scale
    w2p = _pad_to(params["w2"], H1P, H2P)
    b2p = _pad_to(params["b2"], H2P)
    w2_eff = (w2p * scale[:, None]).astype(jnp.bfloat16)
    b2_eff = (b2p + shift @ w2p).reshape(1, H2P)       # f32
    w3 = _pad_to(params["w3"], H2P, OUTP).astype(jnp.bfloat16)
    b3 = _pad_to(params["b3"], OUTP).reshape(1, OUTP)

    # ---- pass 2 ----
    flops2 = 2 * b_pad * (H1P * H2P + H2P * OUTP)
    bytes2 = (b_pad * H1P * 2 + (H1P * H2P + H2P * OUTP) * 2
              + (H2P + OUTP) * 4 + b_pad * OUTP * 4)
    out_pad = pl.pallas_call(
        _layer23_kernel,
        out_shape=jax.ShapeDtypeStruct((b_pad, OUTP), jnp.float32),
        grid_spec=pltpu.PrefetchScalarGridSpec(
            num_scalar_prefetch=0,
            grid=(n_tiles,),
            in_specs=[
                pl.BlockSpec((tile_b, H1P), lambda i: (i, 0)),      # h1 streams per tile
                pl.BlockSpec((H1P, H2P), lambda i: (0, 0)),         # W2' resident
                pl.BlockSpec((1, H2P), lambda i: (0, 0)),
                pl.BlockSpec((H2P, OUTP), lambda i: (0, 0)),        # W3 resident
                pl.BlockSpec((1, OUTP), lambda i: (0, 0)),
            ],
            out_specs=pl.BlockSpec((tile_b, OUTP), lambda i: (i, 0))),
        # Independent tiles -> parallel axis (sharded across both TCs on v7x).
        compiler_params=pltpu.CompilerParams(dimension_semantics=("parallel",)),
        cost_estimate=pl.CostEstimate(flops=flops2, transcendentals=0,
                                      bytes_accessed=bytes2),
    )(h1, w2_eff, b2_eff, w3, b3)

    # Lane-dense (b_pad, 128) slab -> slice to the logical (B, 1) output.
    return out_pad[:B, :OUT]


def init_params(key):
    """Deterministic init mirroring PyTorch defaults (U(-1/sqrt(fan_in), 1/sqrt(fan_in)))."""
    ks = jax.random.split(key, 6)

    def linear(kw, kb, fan_in, fan_out):
        bound = 1.0 / math.sqrt(fan_in)
        w = jax.random.uniform(kw, (fan_in, fan_out), jnp.float32, -bound, bound)
        b = jax.random.uniform(kb, (fan_out,), jnp.float32, -bound, bound)
        return w, b

    w1, b1 = linear(ks[0], ks[1], IN_DIM, H1)
    w2, b2 = linear(ks[2], ks[3], H1, H2)
    w3, b3 = linear(ks[4], ks[5], H2, OUT)
    return {"w1": w1, "b1": b1, "w2": w2, "b2": b2, "w3": w3, "b3": b3,
            "gamma": jnp.ones((H1,), jnp.float32),   # BatchNorm1d defaults
            "beta": jnp.zeros((H1,), jnp.float32)}


def _reference_forward(x, p):
    """Pure-JAX f32 reference of the module semantics (eval-mode dropout, training-mode BN)."""
    h1 = jnp.maximum(x @ p["w1"] + p["b1"], 0.0)
    mean = jnp.mean(h1, axis=0)
    var = jnp.mean((h1 - mean) ** 2, axis=0)
    h1n = (h1 - mean) * jax.lax.rsqrt(var + BN_EPS) * p["gamma"] + p["beta"]
    h2 = jnp.maximum(h1n @ p["w2"] + p["b2"], 0.0)
    return h2 @ p["w3"] + p["b3"]


if __name__ == "__main__":
    key = jax.random.PRNGKey(0)
    k_x, k_p = jax.random.split(key)

    # Small demo: batch deliberately NOT a multiple of the tile to exercise the
    # multi-tile grid, batch padding and the masked BN-statistics path.
    batch = 300
    x = jax.random.normal(k_x, (batch, IN_DIM), jnp.float32)
    params = init_params(k_p)

    out = binary_classification_forward(x, params, tile_b=128)   # 3 batch tiles
    out = jax.block_until_ready(out)

    ref = _reference_forward(x, params)
    assert out.shape == (batch, OUT)
    # bf16 MXU inputs (f32 accumulation) -> compare at bf16-appropriate tolerance.
    max_err = float(jnp.max(jnp.abs(out - ref)))
    assert jnp.allclose(out, ref, atol=2e-2, rtol=2e-2), f"mismatch vs reference, max_err={max_err}"

    print("KERNEL_OK")
</pallas_src>

<mosaic_0001>
module attributes {stable_mosaic.version = 11 : i64} {
  func.func @_layer1_stats_kernel(%arg0: i32, %arg1: memref<128x192xf32, #tpu.memory_space<vmem>>, %arg2: memref<192x256xbf16, #tpu.memory_space<vmem>>, %arg3: memref<1x256xf32, #tpu.memory_space<vmem>>, %arg4: memref<128x256xbf16, #tpu.memory_space<vmem>>, %arg5: memref<2x256xf32, #tpu.memory_space<vmem>>) attributes {dimension_semantics = [#tpu.dimension_semantics<arbitrary>], iteration_bounds = array<i64: 3>, scalar_prefetch = 0 : i64, scratch_operands = 0 : i64, tpu.core_type = #tpu.core_type<tc>, window_params = [{transform_indices = @transform_0, window_bounds = array<i64: 128, 192>}, {pipeline_mode = #tpu.pipeline_mode<synchronous>, transform_indices = @transform_1, window_bounds = array<i64: 192, 256>}, {pipeline_mode = #tpu.pipeline_mode<synchronous>, transform_indices = @transform_2, window_bounds = array<i64: 1, 256>}, {transform_indices = @transform_3, window_bounds = array<i64: 128, 256>}, {pipeline_mode = #tpu.pipeline_mode<synchronous>, transform_indices = @transform_4, window_bounds = array<i64: 2, 256>}]} {
    %c0_i32 = arith.constant 0 : i32
    %0 = arith.cmpi eq, %arg0, %c0_i32 : i32
    %1 = arith.extui %0 : i1 to i32
    %c0_i32_0 = arith.constant 0 : i32
    %2 = arith.cmpi ne, %1, %c0_i32_0 : i32
    scf.if %2 {
      %cst_16 = arith.constant 0.000000e+00 : f32
      %33 = vector.broadcast %cst_16 : f32 to vector<2x256xf32>
      %c0_17 = arith.constant 0 : index
      %c0_18 = arith.constant 0 : index
      %34 = vector.load %arg5[%c0_17, %c0_18] : memref<2x256xf32, #tpu.memory_space<vmem>>, vector<2x256xf32>
      tpu.vector_store %arg5[%c0_17, %c0_18], %33 {strides = array<i32>} : memref<2x256xf32, #tpu.memory_space<vmem>>, vector<2x256xf32>,
    } else {
    }
    %c0 = arith.constant 0 : index
    %c0_1 = arith.constant 0 : index
    %3 = vector.load %arg1[%c0, %c0_1] : memref<128x192xf32, #tpu.memory_space<vmem>>, vector<128x192xf32>
    %4 = arith.truncf %3 : vector<128x192xf32> to vector<128x192xbf16>
    %c0_2 = arith.constant 0 : index
    %c0_3 = arith.constant 0 : index
    %5 = vector.load %arg2[%c0_2, %c0_3] : memref<192x256xbf16, #tpu.memory_space<vmem>>, vector<192x256xbf16>
    %cst = arith.constant dense<0.000000e+00> : vector<128x256xf32>
    %6 = tpu.matmul %4, %5, %cst {dimension_numbers = #tpu.dot_dimension_numbers<[1], [0], [0], [1], [0, 0, 1, 1], [], []>} : vector<128x192xbf16>, vector<192x256xbf16>, vector<128x256xf32> -> vector<128x256xf32>
    %c0_4 = arith.constant 0 : index
    %c0_5 = arith.constant 0 : index
    %7 = vector.load %arg3[%c0_4, %c0_5] : memref<1x256xf32, #tpu.memory_space<vmem>>, vector<1x256xf32>
    %8 = vector.broadcast %7 : vector<1x256xf32> to vector<128x256xf32>
    %9 = arith.addf %6, %8 : vector<128x256xf32>
    %cst_6 = arith.constant 0.000000e+00 : f32
    %10 = vector.broadcast %cst_6 : f32 to vector<128x256xf32>
    %11 = arith.maximumf %9, %10 : vector<128x256xf32>
    %c128_i32 = arith.constant 128 : i32
    %12 = arith.muli %arg0, %c128_i32 : i32
    %13 = tpu.iota {dimensions = array<i32: 0>} : vector<128x1xi32>
    %14 = vector.broadcast %12 : i32 to vector<128x1xi32>
    %15 = arith.addi %14, %13 : vector<128x1xi32>
    %c300_i32 = arith.constant 300 : i32
    %16 = vector.broadcast %c300_i32 : i32 to vector<128x1xi32>
    %17 = arith.cmpi slt, %15, %16 : vector<128x1xi32>
    %cst_7 = arith.constant 0.000000e+00 : f32
    %18 = vector.shape_cast %17 : vector<128x1xi1> to vector<128x1xi1>
    %19 = vector.broadcast %18 : vector<128x1xi1> to vector<128x256xi1>
    %20 = vector.broadcast %cst_7 : f32 to vector<128x256xf32>
    %21 = arith.select %19, %11, %20 : vector<128x256xi1>, vector<128x256xf32>
    %c0_8 = arith.constant 0 : index
    %c0_9 = arith.constant 0 : index
    %22 = vector.load %arg5[%c0_8, %c0_9] : memref<2x256xf32, #tpu.memory_space<vmem>>, vector<2x256xf32>
    %cst_10 = arith.constant dense<0.000000e+00> : vector<256xf32>
    %23 = vector.multi_reduction <add>, %21, %cst_10 [0] : vector<128x256xf32> to vector<256xf32>
    %24 = vector.shape_cast %23 : vector<256xf32> to vector<1x256xf32>
    %25 = arith.mulf %21, %21 : vector<128x256xf32>
    %cst_11 = arith.constant dense<0.000000e+00> : vector<256xf32>
    %26 = vector.multi_reduction <add>, %25, %cst_11 [0] : vector<128x256xf32> to vector<256xf32>
    %27 = vector.shape_cast %26 : vector<256xf32> to vector<1x256xf32>
    %28 = tpu.concatenate %24, %27 in 0 : vector<1x256xf32>, vector<1x256xf32> -> vector<2x256xf32>
    %29 = arith.addf %22, %28 : vector<2x256xf32>
    %c0_12 = arith.constant 0 : index
    %c0_13 = arith.constant 0 : index
    %30 = vector.load %arg5[%c0_12, %c0_13] : memref<2x256xf32, #tpu.memory_space<vmem>>, vector<2x256xf32>
    tpu.vector_store %arg5[%c0_12, %c0_13], %29 {strides = array<i32>} : memref<2x256xf32, #tpu.memory_space<vmem>>, vector<2x256xf32>,
    %31 = arith.truncf %11 : vector<128x256xf32> to vector<128x256xbf16>
    %c0_14 = arith.constant 0 : index
    %c0_15 = arith.constant 0 : index
    %32 = vector.load %arg4[%c0_14, %c0_15] : memref<128x256xbf16, #tpu.memory_space<vmem>>, vector<128x256xbf16>
    tpu.vector_store %arg4[%c0_14, %c0_15], %31 {strides = array<i32>} : memref<128x256xbf16, #tpu.memory_space<vmem>>, vector<128x256xbf16>,
    return
  }
  func.func @transform_0(%arg0: i32) -> (i32, i32) {
    %c0_i32 = arith.constant 0 : i32
    %c0_i32_0 = arith.constant 0 : i32
    return %arg0, %c0_i32 : i32, i32
  }
  func.func @transform_1(%arg0: i32) -> (i32, i32) {
    %c0_i32 = arith.constant 0 : i32
    %c0_i32_0 = arith.constant 0 : i32
    %c0_i32_1 = arith.constant 0 : i32
    return %c0_i32, %c0_i32_0 : i32, i32
  }
  func.func @transform_2(%arg0: i32) -> (i32, i32) {
    %c0_i32 = arith.constant 0 : i32
    %c0_i32_0 = arith.constant 0 : i32
    %c0_i32_1 = arith.constant 0 : i32
    return %c0_i32, %c0_i32_0 : i32, i32
  }
  func.func @transform_3(%arg0: i32) -> (i32, i32) {
    %c0_i32 = arith.constant 0 : i32
    %c0_i32_0 = arith.constant 0 : i32
    return %arg0, %c0_i32 : i32, i32
  }
  func.func @transform_4(%arg0: i32) -> (i32, i32) {
    %c0_i32 = arith.constant 0 : i32
    %c0_i32_0 = arith.constant 0 : i32
    %c0_i32_1 = arith.constant 0 : i32
    return %c0_i32, %c0_i32_0 : i32, i32
  }
}

</mosaic_0001>

<bundles_post_ra>
// kernel: tpu_custom_call.1
= control target key start
LH: loop header
LB: loop body
LE: loop exit
PB: predicated region body
PF: predicated region fallthrough
CT: control target
= control target key end

     0   :  { %10 = vsyncpa [#allocation3], 0  ;;  %s1889_s0 = inlined_call_operand.vmem [shape: f32[384,192], index: 0, kind: input, shape index: {}]   ;;  %s1890_s1 = inlined_call_operand.vmem [shape: bf16[192,256], index: 1, kind: input, shape index: {}]   ;;  %s1891_s2 = inlined_call_operand.vmem [shape: f32[1,256], index: 2, kind: input, shape index: {}]   ;;  %s1892_s3 = inlined_call_operand.hbm [shape: bf16[384,256], index: 3, kind: output, shape index: {0}]   ;;  %s1893_s4 = inlined_call_operand.hbm [shape: f32[2,256], index: 4, kind: output, shape index: {1}]  }
   0x1   :  { %12 = vsyncpa [#allocation3 + $0x1], 0 }
   0x2   :  { %13 = vsyncpa [#allocation5], 0  ;;  %s1360_s15 = smov 0   ;;  %s1362_s16 = smov 0  }
   0x3   :  { %s1364_s17 = smov 0   ;;  %s1366_s18 = smov 0  }
   0x4 LB: > { %s1381_s19 = sadd.s32 4294967295, %s1327_s18   ;;  %s1040_s20 = sadd.s32 4294967294, %s1327_s18   ;;  %s1327_s18 = sphi %s1366_s18, %s1899_s18   ;;  %s1323_s17 = sphi %s1364_s17, %s1898_s17   ;;  %s1319_s16 = sphi %s1362_s16, %s1897_s16   ;;  %s1315_s15 = sphi %s1360_s15, %s1896_s15  }
   0x5   : > { %s1385_s21 = sadd.s32 1, %s1327_s18   ;;  %s94_s22 = sadd.s32 1, %s1323_s17 }
   0x6   : > { %s91_s23 = ssub.s32 %s1327_s18, %s1385_s21  ;;  %p104_p0 = scmp.ne.s32.totalorder %s1323_s17, %s1319_s16 }
   0x7   : > { %p92_p1 = scmp.eq.s32.totalorder %s91_s23, 0  ;;  %p105_p2 = scmp.eq.s32.totalorder %s1381_s19, 2 }
   0x8   : > { %p110_p3 = scmp.ne.s32.totalorder %s1319_s16, %s1315_s15  ;;  %p111_p4 = scmp.eq.s32.totalorder %s1040_s20, 2 }
   0x9   : > { %s1396_s24 = scalar_select %p92_p1, %s1323_s17, %s94_s22  }
   0xa   : > { %p1400_p5 = por %p105_p2, %p104_p0  ;;  %p1404_p6 = por %p111_p4, %p110_p3 }
   0xb   : > { %p1043_p7 = scmp.ge.s32.totalorder %s1327_s18, 1  ;;  %p166_p8 = scmp.lt.s32.totalorder %s1327_s18, 4 }
   0xd   : > { %p167_p9 = pnand %p1043_p7, %p166_p8 }
   0xe   : > { %s188_s27 = sand.u32 (!%p167_p9), 1, %s1319_s16   ;;  %s1045_s28 = sshll.u32 (!%p167_p9), %s1381_s19, 4 }
   0xf   : > { %170 = sbr.rel (%p167_p9) target bundleno = 392 (0x188), region = 32  ;;  %s1044_s29 = sshll.u32 (!%p167_p9), %s188_s27, 7 }
  0x10   : > { %p194_p10 = scmp.lt.s32.totalorder (!%p167_p9), %s1045_s28, 47  ;;  %s1419_s8 = scalar_lea.vmem (!%p167_p9), [#allocation2], %s1044_s29 }
  0x11   : > { %p1048_p11 = scmp.ne.s32.totalorder (!%p167_p9), %s1381_s19, 0 }
  0x16   : > { %s1901_s28 = smov (!%p194_p10, %s1045_s28), 47  ;;  %205 = sbr.rel (%p1048_p11) target bundleno = 29 (0x1d), region = 36 }
  0x17   : > { %s1106_s30 = sshll.u32 %s1901_s28, 4  ;;  %v1329_v0 = vmov (!%p1048_p11), 0.0  }
  0x18   : > { %s1417_s7 = scalar_lea.vmem %s1889_s0, %s1106_s30  ;;  %206 = vst [vmem:[#allocation4] sm:$0xf] (!%p1048_p11), %v1329_v0 }
  0x1d PF: > { %v1199_v1 = vld [vmem:[%s1890_s1 + $0x4] ss:$8 sps:$4 sm:$0xff]   ;;  %v1201_v2 = vld [vmem:[%s1890_s1] ss:$8 sps:$4 sm:$0xff]   ;;  %v1202_v3 = vld [vmem:[%s1890_s1 + $0x14] ss:$8 sps:$4 sm:$0xff]  }
  0x1e   : > { %436 = vmatprep.subr.bf16.mxu0 %v1199_v1  ;;  %1125 = vmatprep.subr.bf16.mxu1 %v1199_v1  ;;  %v1204_v4 = vld [vmem:[%s1890_s1 + $0x10] ss:$8 sps:$4 sm:$0xff]   ;;  %v1205_v5 = vld [vmem:[%s1890_s1 + $0x24] ss:$8 sps:$4 sm:$0xff]   ;;  %v1207_v6 = vld [vmem:[%s1890_s1 + $0x20] ss:$8 sps:$4 sm:$0xff]  }
  0x1f   : > { %437 = vmatpush1.bf16.msra.mxu0 %v1201_v2  ;;  %1137 = vmatpush1.bf16.msra.mxu1 %v1201_v2  ;;  %v1208_v7 = vld [vmem:[%s1890_s1 + $0x34] ss:$8 sps:$4 sm:$0xff]   ;;  %v1210_v8 = vld [vmem:[%s1890_s1 + $0x30] ss:$8 sps:$4 sm:$0xff]   ;;  %v1211_v9 = vld [vmem:[%s1890_s1 + $0x44] ss:$8 sps:$4 sm:$0xff]  }
  0x20   : > { %438 = vmatprep.subr.bf16.mxu0 %v1202_v3  ;;  %1126 = vmatprep.subr.bf16.mxu1 %v1202_v3  ;;  %v1213_v10 = vld [vmem:[%s1890_s1 + $0x40] ss:$8 sps:$4 sm:$0xff]   ;;  %v1214_v11 = vld [vmem:[%s1890_s1 + $0x54] ss:$8 sps:$4 sm:$0xff]   ;;  %vm411_vm0 = vcmask 523264   ;;  %s1081_s20 = sshll.u32 %s1381_s19, 7 }
  0x21   : > { %v208_v12 = vld [vmem:[%s1417_s7 + $0x8] sm:$0xff]  ;;  %v210_v13 = vld [vmem:[%s1417_s7 + $0x18] sm:$0xff]  ;;  %v207_v31 = vld [vmem:[%s1417_s7] sm:$0xff]  ;;  %s956_s28 = sshll.u32 %s1419_s8, 4  ;;  %s1825_s6 = scalar_lea.sflag [#allocation3], %s188_s27  ;;  %s1818_s28 = int_to_ptr.vmem [resolvable:$true] %s956_s28 }
  0x22   : > { %v240_v14 = vpack.c.bf16 %v210_v13, %v208_v12  ;;  %v224_v15 = vld [vmem:[%s1417_s7 + $0x88] sm:$0xff]  ;;  %v1216_v16 = vld [vmem:[%s1890_s1 + $0x50] ss:$8 sps:$4 sm:$0xff]   ;;  %v1220_v21 = vld [vmem:[%s1890_s1 + $0x74] ss:$8 sps:$4 sm:$0xff]   ;;  %v599_v13 = vstv %s1081_s20  ;;  %s1235_s9 = scalar_lea.vmem %s1818_s28, 2048 }
  0x23   : > { %439 = vmatpush1.bf16.msra.mxu0 %v1204_v4  ;;  %1138 = vmatpush1.bf16.msra.mxu1 %v1204_v4  ;;  %v226_v17 = vld [vmem:[%s1417_s7 + $0x98] sm:$0xff]  ;;  %v1217_v18 = vld [vmem:[%s1890_s1 + $0x64] ss:$8 sps:$4 sm:$0xff]   ;;  %v1219_v20 = vld [vmem:[%s1890_s1 + $0x60] ss:$8 sps:$4 sm:$0xff]   ;;  %p1236_p12 = scmp.ne.s32.totalorder %s1818_s28, %s1235_s9  ;;  %s1330_s10 = smov [#allocation2]  }
  0x24   : > { %440 = vmatprep.subr.bf16.mxu0 %v1205_v5  ;;  %1127 = vmatprep.subr.bf16.mxu1 %v1205_v5  ;;  %v248_v19 = vpack.c.bf16 %v226_v17, %v224_v15  ;;  %v1222_v22 = vld [vmem:[%s1890_s1 + $0x70] ss:$8 sps:$4 sm:$0xff]   ;;  %v1223_v23 = vld [vmem:[%s1890_s1 + $0x84] ss:$8 sps:$4 sm:$0xff]   ;;  %v1225_v24 = vld [vmem:[%s1890_s1 + $0x80] ss:$8 sps:$4 sm:$0xff]  }
  0x25   : > { %1073 = vmatprep.mubr.msk.bf16.mxu0 %vm411_vm0, %v240_v14  ;;  %v1226_v25 = vld [vmem:[%s1890_s1 + $0x94] ss:$8 sps:$4 sm:$0xff]   ;;  %v1228_v26 = vld [vmem:[%s1890_s1 + $0x90] ss:$8 sps:$4 sm:$0xff]   ;;  %v1229_v27 = vld [vmem:[%s1890_s1 + $0xa4] ss:$8 sps:$4 sm:$0xff]   ;;  %p1237_p13 = pnand %p1236_p12, %p1400_p5 }
  0x26   : > { %1077 = vmatprep.mubr.msk.bf16.mxu1 %vm411_vm0, %v248_v19  ;;  %v1231_v28 = vld [vmem:[%s1890_s1 + $0xa0] ss:$8 sps:$4 sm:$0xff]   ;;  %v1232_v29 = vld [vmem:[%s1890_s1 + $0xb4] ss:$8 sps:$4 sm:$0xff]   ;;  %v1234_v30 = vld [vmem:[%s1890_s1 + $0xb0] ss:$8 sps:$4 sm:$0xff]  }
  0x27   : > { %441 = vmatpush1.bf16.msra.mxu0 %v1207_v6  ;;  %1139 = vmatpush1.bf16.msra.mxu1 %v1207_v6  ;;  %v209_v32 = vld [vmem:[%s1417_s7 + $0x10] sm:$0xff]  ;;  %v212_v33 = vld [vmem:[%s1417_s7 + $0x28] sm:$0xff]  ;;  %v223_v34 = vld [vmem:[%s1417_s7 + $0x80] sm:$0xff]  ;;  %p1238_p0 = pneg %p1237_p13  ;;  %s1239_s11 = sshll.u32 %s1330_s10, 4  ;;  %s1240_s11 = int_to_ptr.vmem [resolvable:$false] %s1239_s11 }
  0x28   : > { %442 = vmatprep.subr.bf16.mxu0 %v1208_v7  ;;  %1128 = vmatprep.subr.bf16.mxu1 %v1208_v7  ;;  %v225_v35 = vld [vmem:[%s1417_s7 + $0x90] sm:$0xff]  ;;  %v214_v36 = vld [vmem:[%s1417_s7 + $0x38] sm:$0xff]  ;;  %v228_v37 = vld [vmem:[%s1417_s7 + $0xa8] sm:$0xff]  ;;  %v239_v39 = vpack.c.bf16 %v209_v32, %v207_v31  ;;  %s1241_s12 = scalar_lea.vmem %s1240_s11, 4096  ;;  %p1242_p1 = scmp.lt.s32.totalorder %s1818_s28, %s1240_s11 }
  0x29   : > { %v230_v38 = vld [vmem:[%s1417_s7 + $0xb8] sm:$0xff]  ;;  %v247_v40 = vpack.c.bf16 %v225_v35, %v223_v34  ;;  %v242_v41 = vpack.c.bf16 %v214_v36, %v212_v33  ;;  %v211_v43 = vld [vmem:[%s1417_s7 + $0x20] sm:$0xff]  ;;  %v213_v44 = vld [vmem:[%s1417_s7 + $0x30] sm:$0xff]  ;;  %p1243_p3 = scmp.lt.s32.totalorder %s1241_s12, %s1235_s9 }
  0x2a   : > { %v250_v42 = vpack.c.bf16 %v230_v38, %v228_v37  ;;  %v216_v45 = vld [vmem:[%s1417_s7 + $0x48] sm:$0xff]  ;;  %v227_v46 = vld [vmem:[%s1417_s7 + $0xa0] sm:$0xff]  ;;  %v229_v47 = vld [vmem:[%s1417_s7 + $0xb0] sm:$0xff]  ;;  %v241_v51 = vpack.c.bf16 %v213_v44, %v211_v43 }
  0x2b   : > { %443 = vmatpush1.bf16.msra.mxu0 %v1210_v8  ;;  %1140 = vmatpush1.bf16.msra.mxu1 %v1210_v8  ;;  %v218_v48 = vld [vmem:[%s1417_s7 + $0x58] sm:$0xff]  ;;  %v232_v49 = vld [vmem:[%s1417_s7 + $0xc8] sm:$0xff]  ;;  %v249_v52 = vpack.c.bf16 %v229_v47, %v227_v46  ;;  %v215_v55 = vld [vmem:[%s1417_s7 + $0x40] sm:$0xff]  ;;  %p1244_p4 = por %p1243_p3, %p1242_p1 }
  0x2c   : > { %444 = vmatprep.subr.bf16.mxu0 %v1211_v9  ;;  %1129 = vmatprep.subr.bf16.mxu1 %v1211_v9  ;;  %v234_v50 = vld [vmem:[%s1417_s7 + $0xd8] sm:$0xff]  ;;  %v244_v53 = vpack.c.bf16 %v218_v48, %v216_v45  ;;  %v217_v56 = vld [vmem:[%s1417_s7 + $0x50] sm:$0xff]  ;;  %v220_v57 = vld [vmem:[%s1417_s7 + $0x68] sm:$0xff]  ;;  %v281_v9 = vlaneseq }
  0x2d   : > { %v252_v54 = vpack.c.bf16 %v234_v50, %v232_v49  ;;  %v231_v58 = vld [vmem:[%s1417_s7 + $0xc0] sm:$0xff]  ;;  %v233_v59 = vld [vmem:[%s1417_s7 + $0xd0] sm:$0xff]  ;;  %v222_v60 = vld [vmem:[%s1417_s7 + $0x78] sm:$0xff]  ;;  %v243_v63 = vpack.c.bf16 %v217_v56, %v215_v55  ;;  %p1245_p7 = pnand %p1244_p4, %p1238_p0 }
  0x2e   : > { %v236_v61 = vld [vmem:[%s1417_s7 + $0xe8] sm:$0xff]  ;;  %v238_v62 = vld [vmem:[%s1417_s7 + $0xf8] sm:$0xff]  ;;  %v251_v0 = vpack.c.bf16 %v233_v59, %v231_v58  ;;  %v246_v1 = vpack.c.bf16 %v222_v60, %v220_v57  ;;  %v219_v3 = vld [vmem:[%s1417_s7 + $0x60] sm:$0xff] }
  0x2f   : > { %445 = vmatpush1.bf16.msra.mxu0 %v1213_v10  ;;  %1141 = vmatpush1.bf16.msra.mxu1 %v1213_v10  ;;  %v254_v2 = vpack.c.bf16 %v238_v62, %v236_v61  ;;  %v221_v4 = vld [vmem:[%s1417_s7 + $0x70] sm:$0xff]  ;;  %v235_v5 = vld [vmem:[%s1417_s7 + $0xe0] sm:$0xff]  ;;  %v1534_v10 = vshrl.u32 %v281_v9, 7 }
  0x30   : > { %446 = vmatprep.subr.bf16.mxu0 %v1214_v11  ;;  %1130 = vmatprep.subr.bf16.mxu1 %v1214_v11  ;;  %v237_v6 = vld [vmem:[%s1417_s7 + $0xf0] sm:$0xff]  ;;  %v245_v7 = vpack.c.bf16 %v221_v4, %v219_v3  ;;  %v279_v15 = vld [vmem:[%s1891_s2] sm:$0x3]  ;;  %s1124_s7 = sshll.u32 %s1381_s19, 11 }
  0x31   : > { %v253_v8 = vpack.c.bf16 %v237_v6, %v235_v5  ;;  %v584_v11 = vadd.s32 8, %v1534_v10  ;;  %v283_v12 = vsub.s32 0, %v1534_v10  ;;  %v287_v14 = vsub.s32 1, %v1534_v10  ;;  %s1816_s5 = scalar_lea.hbm %s1892_s3, %s1124_s7 }
  0x32   : > { %v592_v17 = vadd.s32 72, %v1534_v10  ;;  %v590_v31 = vadd.s32 56, %v1534_v10  ;;  %v595_v32 = vadd.s32 96, %v1534_v10  ;;  %v596_v33 = vadd.s32 104, %v1534_v10 }
  0x33   : > { %447 = vmatpush1.bf16.msra.mxu0 %v1216_v16  ;;  %1142 = vmatpush1.bf16.msra.mxu1 %v1216_v16  ;;  %v591_v16 = vadd.s32 64, %v1534_v10  ;;  %v1546_v19 = vadd.s32 %v599_v13, %v584_v11  ;;  %v597_v36 = vadd.s32 112, %v1534_v10  ;;  %v598_v37 = vadd.s32 120, %v1534_v10 }
  0x34   : > { %448 = vmatprep.subr.bf16.mxu0 %v1217_v18  ;;  %1131 = vmatprep.subr.bf16.mxu1 %v1217_v18  ;;  %v600_v18 = vadd.s32 %v599_v13, %v1534_v10  ;;  %v1582_v45 = vadd.s32 %v599_v13, %v590_v31  ;;  %v1586_v50 = vadd.s32 %v599_v13, %v595_v32 }
  0x35   : > { %vm617_vm2 = vcmp.lt.s32.totalorder %v1546_v19, 300  ;;  %v1593_v56 = vadd.s32 %v599_v13, %v597_v36  ;;  %v1595_v57 = vadd.s32 %v599_v13, %v598_v37 }
  0x36   : > { %vm616_vm1 = vcmp.lt.s32.totalorder %v600_v18, 300  ;;  %vm623_vm12 = vcmp.lt.s32.totalorder %v1582_v45, 300  ;;  %vm628_vm13 = vcmp.lt.s32.totalorder %v1586_v50, 300 }
  0x37   : > { %449 = vmatpush1.bf16.msra.mxu0 %v1219_v20  ;;  %1143 = vmatpush1.bf16.msra.mxu1 %v1219_v20  ;;  %v1548_v20 = vrot.slane %v279_v15, %v283_v12  ;;  %vm630_vm15 = vcmp.lt.s32.totalorder %v1593_v56, 300 }
  0x38   : > { %450 = vmatprep.subr.bf16.mxu0 %v1220_v21  ;;  %1132 = vmatprep.subr.bf16.mxu1 %v1220_v21  ;;  %v1550_v21 = vrot.slane %v279_v15, %v287_v14 }
  0x3b   : > { %451 = vmatpush1.bf16.msra.mxu0 %v1222_v22  ;;  %1144 = vmatpush1.bf16.msra.mxu1 %v1222_v22  ;;  %v585_v22 = vadd.s32 16, %v1534_v10 }
  0x3c   : > { %452 = vmatprep.subr.bf16.mxu0 %v1223_v23  ;;  %1133 = vmatprep.subr.bf16.mxu1 %v1223_v23  ;;  %v586_v23 = vadd.s32 24, %v1534_v10 }
  0x3d   : > { %v1565_v34 = vadd.s32 %v599_v13, %v585_v22 }
  0x3e   : > { %v1567_v35 = vadd.s32 %v599_v13, %v586_v23 }
  0x3f   : > { %453 = vmatpush1.bf16.msra.mxu0 %v1225_v24  ;;  %1145 = vmatpush1.bf16.msra.mxu1 %v1225_v24  ;;  %v608_v24 = vadd.s32 %v599_v13, %v591_v16  ;;  %vm618_vm5 = vcmp.lt.s32.totalorder %v1565_v34, 300 }
  0x40   : > { %454 = vmatprep.subr.bf16.mxu0 %v1226_v25  ;;  %1134 = vmatprep.subr.bf16.mxu1 %v1226_v25  ;;  %v1554_v25 = vadd.s32 %v599_v13, %v592_v17  ;;  %vm619_vm6 = vcmp.lt.s32.totalorder %v1567_v35, 300 }
  0x41   : > { %vm624_vm3 = vcmp.lt.s32.totalorder %v608_v24, 300 }
  0x42   : > { %vm625_vm4 = vcmp.lt.s32.totalorder %v1554_v25, 300 }
  0x43   : > { %455 = vmatpush1.bf16.msra.mxu0 %v1228_v26  ;;  %1146 = vmatpush1.bf16.msra.mxu1 %v1228_v26  ;;  %v587_v26 = vadd.s32 32, %v1534_v10 }
  0x44   : > { %456 = vmatprep.subr.bf16.mxu0 %v1229_v27  ;;  %1135 = vmatprep.subr.bf16.mxu1 %v1229_v27  ;;  %v588_v27 = vadd.s32 40, %v1534_v10 }
  0x45   : > { %v1572_v38 = vadd.s32 %v599_v13, %v587_v26 }
  0x47   : > { %457 = vmatpush1.bf16.msra.mxu0 %v1231_v28  ;;  %1147 = vmatpush1.bf16.msra.mxu1 %v1231_v28  ;;  %v593_v28 = vadd.s32 80, %v1534_v10  ;;  %vm620_vm7 = vcmp.lt.s32.totalorder %v1572_v38, 300 }
  0x48   : > { %458 = vmatprep.subr.bf16.mxu0 %v1232_v29  ;;  %1136 = vmatprep.subr.bf16.mxu1 %v1232_v29  ;;  %v594_v29 = vadd.s32 88, %v1534_v10 }
  0x4a   : > { %v1578_v43 = vadd.s32 %v599_v13, %v594_v29 }
  0x4b   : > { %459 = vmatpush1.bf16.msra.mxu0 %v1234_v30  ;;  %1148 = vmatpush1.bf16.msra.mxu1 %v1234_v30  ;;  %v589_v30 = vadd.s32 48, %v1534_v10 }
  0x4c   : > { %vm627_vm10 = vcmp.lt.s32.totalorder %v1578_v43, 300 }
  0x4d   : > { %v1580_v44 = vadd.s32 %v599_v13, %v589_v30 }
  0x4e   : > { %469 = vmatmul.mubr.bf16.vlgmr.msra.gmra.mrb[0].mxu0 %v239_v39  ;;  %509 = vmatmul.mubr.bf16.vlgmr.msra.gmra.mrb[0].mxu1 %v247_v40  ;;  %v1574_v39 = vadd.s32 %v599_v13, %v588_v27 }
  0x4f   : > { %1074 = vmatprep.mubr.msk.bf16.mxu0 %vm411_vm0, %v242_v41  ;;  %1078 = vmatprep.mubr.msk.bf16.mxu1 %vm411_vm0, %v250_v42  ;;  %v1576_v42 = vadd.s32 %v599_v13, %v593_v28  ;;  %vm622_vm11 = vcmp.lt.s32.totalorder %v1580_v44, 300 }
  0x50   : > { %vm621_vm9 = vcmp.lt.s32.totalorder %v1574_v39, 300 }
  0x51   : > { %vm626_vm8 = vcmp.lt.s32.totalorder %v1576_v42, 300 }
  0x56   : > { %479 = vmatmul.mubr.bf16.gmra.mrb[4].mxu0 %v241_v51  ;;  %519 = vmatmul.mubr.bf16.gmra.mrb[4].mxu1 %v249_v52  ;;  %v1588_v51 = vadd.s32 %v599_v13, %v596_v33 }
  0x57   : > { %1075 = vmatprep.mubr.msk.bf16.mxu0 %vm411_vm0, %v244_v53  ;;  %1079 = vmatprep.mubr.msk.bf16.mxu1 %vm411_vm0, %v252_v54 }
  0x58   : > { %vm629_vm14 = vcmp.lt.s32.totalorder %v1588_v51, 300 }
  0x5e   : > { %489 = vmatmul.mubr.bf16.gmra.mrb[8].mxu0 %v243_v63  ;;  %529 = vmatmul.mubr.bf16.gmra.mrb[8].mxu1 %v251_v0 }
  0x5f   : > { %1076 = vmatprep.mubr.msk.bf16.mxu0 %vm411_vm0, %v246_v1  ;;  %1080 = vmatprep.mubr.msk.bf16.mxu1 %vm411_vm0, %v254_v2  ;;  %vm631_vm0 = vcmp.lt.s32.totalorder %v1595_v57, 300 }
  0x66   : > { %499 = vmatmul.mubr.bf16.gmra.mrb[12].mxu0 %v245_v7  ;;  %539 = vmatmul.mubr.bf16.gmra.mrb[12].mxu1 %v253_v8 }
 0x121   : > { %v470_v40 = vpop.f32.mrb[0].mxu0  ;;  %v510_v41 = vpop.f32.mrb[0].mxu1 }
 0x122   : > { %v471_v46 = vadd.f32 %v470_v40, %v1548_v20  ;;  %v472_v47 = vpop.f32.mrb[1].mxu0  ;;  %v511_v48 = vadd.f32 %v510_v41, %v1548_v20  ;;  %v512_v49 = vpop.f32.mrb[1].mxu1 }
 0x123   : > { %v473_v52 = vadd.f32 %v472_v47, %v1550_v21  ;;  %v474_v53 = vpop.f32.mrb[2].mxu0  ;;  %v513_v54 = vadd.f32 %v512_v49, %v1550_v21  ;;  %v514_v55 = vpop.f32.mrb[2].mxu1 }
 0x124   : > { %v549_v58 = vmax.f32 %v471_v46, 0.0  ;;  %v475_v59 = vadd.f32 %v474_v53, %v1548_v20  ;;  %v476_v60 = vpop.f32.mrb[3].mxu0  ;;  %v565_v61 = vmax.f32 %v511_v48, 0.0  ;;  %v1599_v62 = vadd.f32 %v514_v55, %v1548_v20  ;;  %v516_v63 = vpop.f32.mrb[3].mxu1 }
 0x125   : > { %v550_v0 = vmax.f32 %v473_v52, 0.0  ;;  %v477_v1 = vadd.f32 %v476_v60, %v1550_v21  ;;  %v566_v2 = vmax.f32 %v513_v54, 0.0  ;;  %v1604_v3 = vadd.f32 %v516_v63, %v1550_v21 }
 0x126   : > { %v664_v4 = vsel %vm616_vm1, %v549_v58, 0.0  ;;  %v551_v5 = vmax.f32 %v475_v59, 0.0  ;;  %v1608_v6 = vsel %vm624_vm3, %v565_v61, 0.0  ;;  %v567_v7 = vmax.f32 %v1599_v62, 0.0 }
 0x127   : > { %v739_v8 = vmul.f32 %v664_v4, %v664_v4  ;;  %v665_v9 = vsel %vm616_vm1, %v550_v0, 0.0  ;;  %v1107_v11 = vpack.c.bf16 %v550_v0, %v549_v58  ;;  %v552_v12 = vmax.f32 %v477_v1, 0.0 }
 0x128   : > { %v740_v13 = vmul.f32 %v665_v9, %v665_v9  ;;  %v666_v14 = vsel %vm617_vm2, %v551_v5, 0.0  ;;  %v1616_v15 = vmul.f32 %v1608_v6, %v1608_v6  ;;  %v1619_v16 = vsel %vm624_vm3, %v566_v2, 0.0 }
 0x129   : > { %925 = vst [vmem:[%s1419_s8] sm:$0xff] %v1107_v11  ;;  %v697_v17 = vadd.f32 %v666_v14, %v664_v4  ;;  %v741_v22 = vmul.f32 %v666_v14, %v666_v14  ;;  %v667_v18 = vsel %vm617_vm2, %v552_v12, 0.0  ;;  %v1108_v23 = vpack.c.bf16 %v552_v12, %v551_v5  ;;  %v480_v26 = vpop.f32.mrb[4].mxu0  ;;  %v520_v27 = vpop.f32.mrb[4].mxu1 }
 0x12a   : > { %v718_v28 = vadd.f32 %v667_v18, %v665_v9  ;;  %v742_v29 = vmul.f32 %v667_v18, %v667_v18  ;;  %v481_v30 = vadd.f32 %v480_v26, %v1548_v20  ;;  %v482_v31 = vpop.f32.mrb[5].mxu0  ;;  %v1627_v24 = vmul.f32 %v1619_v16, %v1619_v16  ;;  %v522_v32 = vpop.f32.mrb[5].mxu1 }
 0x12b   : > { %v771_v33 = vadd.f32 %v741_v22, %v739_v8  ;;  %926 = vst [vmem:[%s1419_s8 + $0x8] sm:$0xff] %v1108_v23  ;;  %v483_v36 = vadd.f32 %v482_v31, %v1550_v21  ;;  %v484_v19 = vpop.f32.mrb[6].mxu0  ;;  %v1115_v37 = vpack.c.bf16 %v566_v2, %v565_v61  ;;  %v1635_v40 = vsel %vm625_vm4, %v567_v7, 0.0  ;;  %v524_v41 = vpop.f32.mrb[6].mxu1 }
 0x12c   : > { %v792_v46 = vadd.f32 %v742_v29, %v740_v13  ;;  %v553_v47 = vmax.f32 %v481_v30, 0.0  ;;  %v485_v48 = vadd.f32 %v484_v19, %v1548_v20  ;;  %v486_v49 = vpop.f32.mrb[7].mxu0  ;;  %v1641_v52 = vmul.f32 %v1635_v40, %v1635_v40  ;;  %v1644_v53 = vpop.f32.mrb[7].mxu1 }
 0x12d   : > { %v554_v54 = vmax.f32 %v483_v36, 0.0  ;;  %v487_v55 = vadd.f32 %v486_v49, %v1550_v21  ;;  %933 = vst [vmem:[%s1419_s8 + $0x40] sm:$0xff] %v1115_v37  ;;  %v568_v58 = vmax.f32 %v1604_v3, 0.0  ;;  %v1651_v59 = vadd.f32 %v520_v27, %v1548_v20 }
 0x12e   : > { %v668_v60 = vsel %vm618_vm5, %v553_v47, 0.0  ;;  %v555_v61 = vmax.f32 %v485_v48, 0.0  ;;  %v1656_v63 = vadd.f32 %v522_v32, %v1550_v21  ;;  %v1659_v0 = vadd.f32 %v524_v41, %v1548_v20 }
 0x12f   : > { %v698_v1 = vadd.f32 %v697_v17, %v668_v60  ;;  %v743_v2 = vmul.f32 %v668_v60, %v668_v60  ;;  %v669_v3 = vsel %vm618_vm5, %v554_v54, 0.0  ;;  %v1109_v4 = vpack.c.bf16 %v554_v54, %v553_v47 }
 0x130   : > { %v719_v5 = vadd.f32 %v718_v28, %v669_v3  ;;  %v744_v8 = vmul.f32 %v669_v3, %v669_v3  ;;  %v670_v9 = vsel %vm619_vm6, %v555_v61, 0.0  ;;  %v556_v11 = vmax.f32 %v487_v55, 0.0 }
 0x131   : > { %v772_v12 = vadd.f32 %v771_v33, %v743_v2  ;;  %927 = vst [vmem:[%s1419_s8 + $0x10] sm:$0xff] %v1109_v4  ;;  %v699_v13 = vadd.f32 %v698_v1, %v670_v9  ;;  %v745_v14 = vmul.f32 %v670_v9, %v670_v9  ;;  %v490_v22 = vpop.f32.mrb[8].mxu0  ;;  %v1668_v17 = vsel %vm625_vm4, %v568_v58, 0.0  ;;  %v1671_v34 = vpop.f32.mrb[8].mxu1 }
 0x132   : > { %v793_v18 = vadd.f32 %v792_v46, %v744_v8  ;;  %v671_v23 = vsel %vm619_vm6, %v556_v11, 0.0  ;;  %v1110_v26 = vpack.c.bf16 %v556_v11, %v555_v61  ;;  %v491_v27 = vadd.f32 %v490_v22, %v1548_v20  ;;  %v492_v28 = vpop.f32.mrb[9].mxu0  ;;  %v1676_v29 = vpop.f32.mrb[9].mxu1 }
 0x133   : > { %v773_v30 = vadd.f32 %v772_v12, %v745_v14  ;;  %v720_v31 = vadd.f32 %v719_v5, %v671_v23  ;;  %v746_v25 = vmul.f32 %v671_v23, %v671_v23  ;;  %v1680_v32 = vmul.f32 %v1668_v17, %v1668_v17  ;;  %v494_v33 = vpop.f32.mrb[10].mxu0  ;;  %v1682_v36 = vpop.f32.mrb[10].mxu1 }
 0x134   : > { %928 = vst [vmem:[%s1419_s8 + $0x18] sm:$0xff] %v1110_v26  ;;  %v557_v35 = vmax.f32 %v491_v27, 0.0  ;;  %v1116_v19 = vpack.c.bf16 %v568_v58, %v567_v7  ;;  %v493_v37 = vadd.f32 %v492_v28, %v1550_v21  ;;  %v495_v41 = vadd.f32 %v494_v33, %v1548_v20  ;;  %v496_v46 = vpop.f32.mrb[11].mxu0  ;;  %v1689_v47 = vpop.f32.mrb[11].mxu1 }
 0x135   : > { %v794_v48 = vadd.f32 %v793_v18, %v746_v25  ;;  %v497_v49 = vadd.f32 %v496_v46, %v1550_v21  ;;  %v569_v54 = vmax.f32 %v1651_v59, 0.0  ;;  %v570_v55 = vmax.f32 %v1656_v63, 0.0 }
 0x136   : > { %v672_v62 = vsel %vm620_vm7, %v557_v35, 0.0  ;;  %934 = vst [vmem:[%s1419_s8 + $0x48] sm:$0xff] %v1116_v19  ;;  %v558_v7 = vmax.f32 %v493_v37, 0.0  ;;  %v559_v58 = vmax.f32 %v495_v41, 0.0  ;;  %v571_v60 = vmax.f32 %v1659_v0, 0.0 }
 0x137   : > { %v700_v61 = vadd.f32 %v699_v13, %v672_v62  ;;  %v747_v1 = vmul.f32 %v672_v62, %v672_v62  ;;  %v560_v2 = vmax.f32 %v497_v49, 0.0  ;;  %v1701_v3 = vsel %vm626_vm8, %v569_v54, 0.0 }
 0x138   : > { %v673_v59 = vsel %vm620_vm7, %v558_v7, 0.0  ;;  %v1111_v63 = vpack.c.bf16 %v558_v7, %v557_v35  ;;  %v674_v4 = vsel %vm621_vm9, %v559_v58, 0.0  ;;  %v1710_v0 = vmul.f32 %v1701_v3, %v1701_v3 }
 0x139   : > { %v774_v5 = vadd.f32 %v773_v30, %v747_v1  ;;  %v721_v8 = vadd.f32 %v720_v31, %v673_v59  ;;  %v748_v9 = vmul.f32 %v673_v59, %v673_v59  ;;  %v701_v11 = vadd.f32 %v700_v61, %v674_v4  ;;  %v500_v12 = vpop.f32.mrb[12].mxu0  ;;  %v1713_v13 = vpop.f32.mrb[12].mxu1 }
 0x13a   : > { %929 = vst [vmem:[%s1419_s8 + $0x20] sm:$0xff] %v1111_v63  ;;  %v749_v38 = vmul.f32 %v674_v4, %v674_v4  ;;  %v675_v14 = vsel %vm621_vm9, %v560_v2, 0.0  ;;  %v1112_v22 = vpack.c.bf16 %v560_v2, %v559_v58  ;;  %v1720_v18 = vsel %vm626_vm8, %v570_v55, 0.0  ;;  %v502_v23 = vpop.f32.mrb[13].mxu0  ;;  %v1722_v26 = vpop.f32.mrb[13].mxu1 }
 0x13b   : > { %v795_v27 = vadd.f32 %v794_v48, %v748_v9  ;;  %v722_v28 = vadd.f32 %v721_v8, %v675_v14  ;;  %v750_v30 = vmul.f32 %v675_v14, %v675_v14  ;;  %v1726_v31 = vmul.f32 %v1720_v18, %v1720_v18  ;;  %v504_v25 = vpop.f32.mrb[14].mxu0  ;;  %v1728_v33 = vpop.f32.mrb[14].mxu1 }
 0x13c   : > { %v775_v39 = vadd.f32 %v774_v5, %v749_v38  ;;  %930 = vst [vmem:[%s1419_s8 + $0x28] sm:$0xff] %v1112_v22  ;;  %v1117_v35 = vpack.c.bf16 %v570_v55, %v569_v54  ;;  %v1733_v42 = vsel %vm627_vm10, %v571_v60, 0.0  ;;  %v501_v19 = vadd.f32 %v500_v12, %v1548_v20  ;;  %v506_v37 = vpop.f32.mrb[15].mxu0  ;;  %v1736_v41 = vpop.f32.mrb[15].mxu1 }
 0x13d   : > { %v796_v46 = vadd.f32 %v795_v27, %v750_v30  ;;  %v1740_v48 = vmul.f32 %v1733_v42, %v1733_v42  ;;  %v527_v49 = vadd.f32 %v1644_v53, %v1550_v21  ;;  %v503_v62 = vadd.f32 %v502_v23, %v1550_v21 }
 0x13e   : > { %935 = vst [vmem:[%s1419_s8 + $0x50] sm:$0xff] %v1117_v35  ;;  %v561_v54 = vmax.f32 %v501_v19, 0.0  ;;  %v505_v55 = vadd.f32 %v504_v25, %v1548_v20  ;;  %v507_v7 = vadd.f32 %v506_v37, %v1550_v21  ;;  %v531_v58 = vadd.f32 %v1671_v34, %v1548_v20 }
 0x13f   : > { %v572_v61 = vmax.f32 %v527_v49, 0.0  ;;  %v562_v1 = vmax.f32 %v503_v62, 0.0  ;;  %v533_v2 = vadd.f32 %v1676_v29, %v1550_v21  ;;  %v535_v53 = vadd.f32 %v1682_v36, %v1548_v20 }
 0x140   : > { %v676_v59 = vsel %vm622_vm11, %v561_v54, 0.0  ;;  %v563_v63 = vmax.f32 %v505_v55, 0.0  ;;  %v564_v4 = vmax.f32 %v507_v7, 0.0  ;;  %v573_v5 = vmax.f32 %v531_v58, 0.0 }
 0x141   : > { %v702_v8 = vadd.f32 %v701_v11, %v676_v59  ;;  %v751_v9 = vmul.f32 %v676_v59, %v676_v59  ;;  %v687_v34 = vsel %vm627_vm10, %v572_v61, 0.0  ;;  %v1118_v12 = vpack.c.bf16 %v572_v61, %v571_v60 }
 0x142   : > { %v762_v38 = vmul.f32 %v687_v34, %v687_v34  ;;  %v677_v29 = vsel %vm622_vm11, %v562_v1, 0.0  ;;  %v1113_v14 = vpack.c.bf16 %v562_v1, %v561_v54  ;;  %v678_v36 = vsel %vm623_vm12, %v563_v63, 0.0 }
 0x143   : > { %v776_v22 = vadd.f32 %v775_v39, %v751_v9  ;;  %936 = vst [vmem:[%s1419_s8 + $0x58] sm:$0xff] %v1118_v12  ;;  %v723_v23 = vadd.f32 %v722_v28, %v677_v29  ;;  %v752_v27 = vmul.f32 %v677_v29, %v677_v29  ;;  %v703_v30 = vadd.f32 %v702_v8, %v678_v36 }
 0x144   : > { %931 = vst [vmem:[%s1419_s8 + $0x30] sm:$0xff] %v1113_v14  ;;  %v753_v43 = vmul.f32 %v678_v36, %v678_v36  ;;  %v679_v60 = vsel %vm623_vm12, %v564_v4, 0.0  ;;  %v1114_v11 = vpack.c.bf16 %v564_v4, %v563_v63  ;;  %v688_v44 = vsel %vm628_vm13, %v573_v5, 0.0 }
 0x145   : > { %v797_v25 = vadd.f32 %v796_v46, %v752_v27  ;;  %v704_v35 = vadd.f32 %v703_v30, %v1608_v6  ;;  %v724_v39 = vadd.f32 %v723_v23, %v679_v60  ;;  %v754_v19 = vmul.f32 %v679_v60, %v679_v60 }
 0x146   : > { %v777_v37 = vadd.f32 %v776_v22, %v753_v43  ;;  %932 = vst [vmem:[%s1419_s8 + $0x38] sm:$0xff] %v1114_v11  ;;  %v763_v28 = vmul.f32 %v688_v44, %v688_v44  ;;  %v574_v49 = vmax.f32 %v533_v2, 0.0  ;;  %v575_v62 = vmax.f32 %v535_v53, 0.0 }
 0x147   : > { %v705_v54 = vadd.f32 %v704_v35, %v1635_v40  ;;  %v725_v45 = vadd.f32 %v724_v39, %v1619_v16  ;;  %v798_v55 = vadd.f32 %v797_v25, %v754_v19  ;;  %v537_v7 = vadd.f32 %v1689_v47, %v1550_v21 }
 0x148   : > { %v778_v6 = vadd.f32 %v777_v37, %v1616_v15  ;;  %v689_v46 = vsel %vm628_vm13, %v574_v49, 0.0  ;;  %v1119_v58 = vpack.c.bf16 %v574_v49, %v573_v5  ;;  %v690_v61 = vsel %vm629_vm14, %v575_v62, 0.0 }
 0x149   : > { %v726_v1 = vadd.f32 %v725_v45, %v1668_v17  ;;  %v799_v40 = vadd.f32 %v798_v55, %v1627_v24  ;;  %v706_v16 = vadd.f32 %v705_v54, %v1701_v3  ;;  %v764_v2 = vmul.f32 %v689_v46, %v689_v46 }
 0x14a   : > { %v779_v47 = vadd.f32 %v778_v6, %v1641_v52  ;;  %937 = vst [vmem:[%s1419_s8 + $0x60] sm:$0xff] %v1119_v58  ;;  %v765_v53 = vmul.f32 %v690_v61, %v690_v61  ;;  %v576_v15 = vmax.f32 %v537_v7, 0.0  ;;  %v541_v50 = vadd.f32 %v1713_v13, %v1548_v20 }
 0x14b   : > { %v800_v59 = vadd.f32 %v799_v40, %v1680_v32  ;;  %v707_v63 = vadd.f32 %v706_v16, %v1733_v42  ;;  %v727_v17 = vadd.f32 %v726_v1, %v1720_v18  ;;  %v543_v24 = vadd.f32 %v1722_v26, %v1550_v21 }
 0x14c   : > { %v780_v3 = vadd.f32 %v779_v47, %v1710_v0  ;;  %v691_v52 = vsel %vm629_vm14, %v576_v15, 0.0  ;;  %v1120_v4 = vpack.c.bf16 %v576_v15, %v575_v62  ;;  %v577_v5 = vmax.f32 %v541_v50, 0.0 }
 0x14d   : > { %v708_v8 = vadd.f32 %v707_v63, %v688_v44  ;;  %v728_v9 = vadd.f32 %v727_v17, %v687_v34  ;;  %v801_v13 = vadd.f32 %v800_v59, %v1726_v31  ;;  %v766_v12 = vmul.f32 %v691_v52, %v691_v52 }
 0x14e   : > { %v781_v32 = vadd.f32 %v780_v3, %v1740_v48  ;;  %938 = vst [vmem:[%s1419_s8 + $0x68] sm:$0xff] %v1120_v4  ;;  %v692_v18 = vsel %vm630_vm15, %v577_v5, 0.0  ;;  %v578_v26 = vmax.f32 %v543_v24, 0.0  ;;  %v545_v0 = vadd.f32 %v1728_v33, %v1548_v20 }
 0x14f   : > { %v729_v51 = vadd.f32 %v728_v9, %v689_v46  ;;  %v802_v42 = vadd.f32 %v801_v13, %v762_v38  ;;  %v709_v29 = vadd.f32 %v708_v8, %v690_v61  ;;  %v767_v34 = vmul.f32 %v692_v18, %v692_v18 }
 0x150   : > { %v782_v14 = vadd.f32 %v781_v32, %v763_v28  ;;  %v693_v31 = vsel %vm630_vm15, %v578_v26, 0.0  ;;  %v1121_v48 = vpack.c.bf16 %v578_v26, %v577_v5  ;;  %v579_v36 = vmax.f32 %v545_v0, 0.0 }
 0x151   : > { %v803_v22 = vadd.f32 %v802_v42, %v764_v2  ;;  %v730_v23 = vadd.f32 %v729_v51, %v691_v52  ;;  %v710_v27 = vadd.f32 %v709_v29, %v692_v18  ;;  %v768_v30 = vmul.f32 %v693_v31, %v693_v31 }
 0x152   : > { %v783_v43 = vadd.f32 %v782_v14, %v765_v53  ;;  %939 = vst [vmem:[%s1419_s8 + $0x70] sm:$0xff] %v1121_v48  ;;  %v694_v20 = vsel %vm631_vm0, %v579_v36, 0.0  ;;  %v547_v33 = vadd.f32 %v1736_v41, %v1550_v21 }
 0x153   : > { %v804_v38 = vadd.f32 %v803_v22, %v766_v12  ;;  %v731_v60 = vadd.f32 %v730_v23, %v693_v31  ;;  %v711_v56 = vadd.f32 %v710_v27, %v694_v20  ;;  %v769_v44 = vmul.f32 %v694_v20, %v694_v20 }
 0x154   : > { %v784_v11 = vadd.f32 %v783_v43, %v767_v34  ;;  %v580_v25 = vmax.f32 %v547_v33, 0.0 }
 0x155   : > { %v805_v35 = vadd.f32 %v804_v38, %v768_v30  ;;  %v712_v39 = vrot.slane %v711_v56, 4 }
 0x156   : > { %v785_v21 = vadd.f32 %v784_v11, %v769_v44  ;;  %v695_v41 = vsel %vm631_vm0, %v580_v25, 0.0  ;;  %v1122_v19 = vpack.c.bf16 %v580_v25, %v579_v36 }
 0x157   : > { %v713_v37 = vadd.f32 %v712_v39, %v711_v56  ;;  %v732_v28 = vadd.f32 %v731_v60, %v695_v41  ;;  %v770_v49 = vmul.f32 %v695_v41, %v695_v41 }
 0x158   : > { %v786_v62 = vrot.slane %v785_v21, 4  ;;  %940 = vst [vmem:[%s1419_s8 + $0x78] sm:$0xff] %v1122_v19 }
 0x159   : > { %v714_v54 = vrot.slane %v713_v37, 2  ;;  %v733_v45 = vrot.slane %v732_v28, 4  ;;  %v806_v55 = vadd.f32 %v805_v35, %v770_v49 }
 0x15a   : > { %1248 = shalt.err (!%p1245_p7)
}
 0x15b   : > { %s1249_s27 = scalar_lea.hbm %s1816_s5, 2048  ;;  %s1253_s14 = scalar_lea.hbm %s1892_s3, 6144 }
 0x15c   : > { %p1250_p8 = scmp.ne.s32.totalorder %s1816_s5, %s1249_s27  ;;  %p1254_p11 = scmp.lt.u32.totalorder %s1816_s5, %s1892_s3 }
 0x15d   : > { %p1255_p12 = scmp.lt.u32.totalorder %s1253_s14, %s1249_s27  ;;  %p1257_p0 = scmp.lt.u32.totalorder %s1249_s27, %s1816_s5 }
 0x15e   : > { %p1251_p9 = pnand %p1250_p8, %p1400_p5 }
 0x15f   : > { %p1256_p13 = por %p1255_p12, %p1254_p11 }
 0x160   : > { %p1252_p10 = pneg %p1251_p9 }
 0x161   : > { %p1258_p1 = por %p1257_p0, %p1256_p13 }
 0x163   : > { %p1259_p3 = pnand %p1258_p1, %p1252_p10 }
 0x165   : > { %1262 = shalt.err (!%p1259_p3)
}
 0x166   : > { %s1331_s23 = smov 128   ;;  %s1332_s7 = smov 8   ;;  %v787_v57 = vadd.f32 %v786_v62, %v785_v21  ;;  %v715_v7 = vadd.f32 %v714_v54, %v713_v37  ;;  %v734_v6 = vadd.f32 %v733_v45, %v732_v28  ;;  %v807_v46 = vrot.slane %v806_v55, 4  ;;  %v696_v32 = vld [vmem:[#allocation4] sm:$0xf] }
 0x167   : > { %1149 = dma.vmem_to_hbm [thread:$0]  (%p1400_p5), %s1818_s28, 2048, %s1816_s5, %s1825_s6, %s1331_s23, %s1331_s23, %s1332_s7   ;;  %v1333_v2 = vmov 1983009808   ;;  %vm813_vm1 = vcmask 1040384  }
 0x168   : > { %v788_v58 = vrot.slane %v787_v57, 2  ;;  %v735_v61 = vrot.slane %v734_v6, 2  ;;  %v808_v1 = vadd.f32 %v807_v46, %v806_v55  ;;  %v716_v40 = vrot.slane %v715_v7, 1  ;;  %s1334_s25 = smov [#allocation4]  }
 0x169   : > { %v820_v47 = vunpack.c.l.s4 %v1333_v2  ;;  %s970_s28 = sshll.u32 %s1334_s25, 4  ;;  %s971_s28 = int_to_ptr.vmem [resolvable:$true] %s970_s28 }
 0x16a   : > { %v789_v16 = vadd.f32 %v788_v58, %v787_v57  ;;  %v736_v53 = vadd.f32 %v735_v61, %v734_v6  ;;  %v809_v15 = vrot.slane %v808_v1, 2  ;;  %v717_v17 = vadd.f32 %v716_v40, %v715_v7  ;;  %s1263_s29 = scalar_lea.vmem %s971_s28, 64  ;;  %p1270_p8 = scmp.lt.s32.totalorder %s971_s28, %s971_s28 }
 0x16b   : > { %v821_v3 = vunpack.c.0.s8 %v820_v47  ;;  %p1264_p5 = scmp.ne.s32.totalorder %s971_s28, %s1263_s29  ;;  %p1271_p9 = scmp.lt.s32.totalorder %s1263_s29, %s1263_s29 }
 0x16c   : > { %v790_v50 = vrot.slane %v789_v16, 1  ;;  %v737_v59 = vrot.slane %v736_v53, 1  ;;  %v810_v63 = vadd.f32 %v809_v15, %v808_v1 }
 0x16d   : > { %v824_v9 = vsub.s32 %v821_v3, %v1534_v10  ;;  %p1265_p4 = pnand %p1264_p5, %p105_p2  ;;  %p1272_p10 = por %p1271_p9, %p1270_p8 }
 0x16e   : > { %v791_v24 = vadd.f32 %v790_v50, %v789_v16  ;;  %v811_v52 = vrot.slane %v810_v63, 1  ;;  %v738_v5 = vadd.f32 %v737_v59, %v736_v53 }
 0x16f   : > { %p1266_p7 = pneg %p1265_p4 }
 0x170   : > { %v814_v4 = vsel %vm813_vm1, %v717_v17, %v791_v24  ;;  %v812_v8 = vadd.f32 %v811_v52, %v810_v63 }
 0x171   : > { %p1273_p11 = pnand %p1272_p10, %p1266_p7 }
 0x172   : > { %v815_v13 = vsel %vm813_vm1, %v738_v5, %v812_v8 }
 0x173   : > { %v818_v12 = vcombine.low %v814_v4, %v815_v13 }
 0x175   : > { %v825_v18 = vrot.slane %v818_v12, %v824_v9 }
 0x177   : > { %v827_v26 = vadd.f32 %v825_v18, %v696_v32 }
 0x179   : > { %828 = vst [vmem:[#allocation4] sm:$0xf] %v827_v26 }
 0x17a   : > { %1276 = shalt.err (!%p1273_p11)
}
 0x17b   : > { %s1277_s6 = scalar_lea.hbm %s1893_s4, 64 }
 0x17c   : > { %p1278_p12 = scmp.ne.s32.totalorder %s1893_s4, %s1277_s6  ;;  %p1283_p1 = scmp.lt.u32.totalorder %s1277_s6, %s1893_s4 }
 0x17e   : > { %p1279_p13 = pnand %p1278_p12, %p105_p2 }
 0x180   : > { %p1280_p0 = pneg %p1279_p13 }
 0x182   : > { %p1285_p3 = pnand %p1283_p1, %p1280_p0 }
 0x184   : > { %1288 = shalt.err (!%p1285_p3)
}
 0x185   : > { %1151 = dma.vmem_to_hbm [thread:$0]  (%p105_p2), %s971_s28, 64, %s1893_s4, [#allocation5]  }
 0x186   : > { %1306 = dma.done.wait (%p105_p2), [#allocation5], 64  }
 0x187   : > { %1308 = vsyncadd (%p105_p2), [#allocation5], 4294967232 }
 0x188 PF: > { %p1161_p5 = scmp.ge.s32.totalorder %s1327_s18, 2  ;;  %s986_s13 = sand.u32 1, %s1315_s15  }
 0x189   : > { %s987_s14 = scalar_lea.sflag [#allocation3], %s986_s13 }
 0x18a   : > { %p1156_p4 = pnand %p1161_p5, %p1404_p6 }
 0x18c   : > { %1310 = dma.done.wait (!%p1156_p4), %s987_s14, 2048  }
 0x18d   : > { %1312 = vsyncadd (!%p1156_p4), %s987_s14, 4294965248  ;;  %p16_p7 = scmp.ge.s32.totalorder %s1385_s21, 5   ;;  %s1896_s15 = smov %s1319_s16 }
 0x18e   : > { %s1897_s16 = smov %s1323_s17  ;;  %s1898_s17 = smov %s1396_s24 }
 0x18f   : > { %s1899_s18 = smov %s1385_s21  ;;  %18 = sbr.rel (!%p16_p7) target bundleno = 4 (0x4), region = 79 }
 0x196   :  { %992 = vsyncpa [#allocation3], 1 }
 0x197   :  { %994 = vsyncpa [#allocation3 + $0x1], 1 }
 0x198   :  { %995 = vsyncpa [#allocation5], 1 }

</bundles_post_ra>
